<compile_context>
chip_gen: v5e
topology: v5e:2x2
jax: 0.10.0
libtpu: 0.0.40
codegen_flags: <defaults>
</compile_context>

<pallas_src>
import functools

import jax
import jax.numpy as jnp
from jax import lax
from jax.experimental import pallas as pl
from jax.experimental.pallas import tpu as pltpu


def _round_up(n, m):
    return ((n + m - 1) // m) * m


def _label_smoothing_kernel(x_ref, tgt_ref, out_ref, *,
                            confidence, smoothing, num_classes):
    x = x_ref[...].astype(jnp.float32)            # (TB, C), upcast in-register
    tgt = tgt_ref[...]                            # (TB, 1) int32

    # Numerically stable per-row logsumexp.
    m = jnp.max(x, axis=-1, keepdims=True)                                  # (TB, 1)
    lse = m + jnp.log(jnp.sum(jnp.exp(x - m), axis=-1, keepdims=True))      # (TB, 1)

    # Single weighted reduction folds x[target] and mean(x)
    # (confidence + smoothing == 1):
    #   loss = lse - sum_j w_j * x_j,  w_j = smoothing/C + confidence*[j==target]
    cols = lax.broadcasted_iota(jnp.int32, (1, num_classes), 1)             # (1, C)
    uniform = smoothing / num_classes
    w = jnp.where(cols == tgt, confidence + uniform, uniform)               # (TB, C)
    weighted = jnp.sum(w * x, axis=-1, keepdims=True)                       # (TB, 1)

    out_ref[...] = lse - weighted                 # per-row loss (padded rows harmless)


def label_smoothing_loss(x, target, smoothing=0.1, *, tile_b=None,
                         vmem_limit_bytes=None):
    """x: (B, C) float logits (f32 or bf16), target: (B,) int labels -> f32 scalar."""
    confidence = 1.0 - smoothing
    B, C = x.shape
    itemsize = x.dtype.itemsize
    row_mult = max(8, 32 // max(1, itemsize))     # 8 (f32), 16 (bf16), 32 (1-byte)

    # Generation-aware sizing: the kernel holds the input tile (double-buffered,
    # wire dtype) plus ~3 f32 temporaries of the tile (upcast x, exp(x-m), w*x).
    try:
        info = pltpu.get_tpu_info()
        vmem_cap = int(getattr(info, "vmem_capacity_bytes", 64 * 1024 * 1024))
    except Exception:  # pragma: no cover - conservative fallback
        vmem_cap = 64 * 1024 * 1024
    if vmem_cap >= 96 * 1024 * 1024:              # v5e / v6e: 128 MiB physical VMEM
        tile_f32_budget = 8 * 1024 * 1024
        default_vmem_limit = 64 * 1024 * 1024
    else:                                         # v7x: 64 MiB physical VMEM
        tile_f32_budget = 3 * 1024 * 1024
        default_vmem_limit = 48 * 1024 * 1024
    if vmem_limit_bytes is None:
        vmem_limit_bytes = default_vmem_limit

    if tile_b is None:
        # Bound only by the f32 working-set budget and the (rounded) batch size;
        # no artificial row cap (large tiles amortize the ~0.35us/step overhead).
        tb = tile_f32_budget // max(1, C * 4)
        tb = max(row_mult, (tb // row_mult) * row_mult)
        tile_b = min(tb, _round_up(B, row_mult))
    tile_b = max(row_mult, _round_up(tile_b, row_mult))

    b_pad = _round_up(B, tile_b)
    num_tiles = b_pad // tile_b

    tgt2d = target.astype(jnp.int32).reshape(B, 1)
    if b_pad != B:
        x = jnp.pad(x, ((0, b_pad - B), (0, 0)))
        tgt2d = jnp.pad(tgt2d, ((0, b_pad - B), (0, 0)))

    kernel = functools.partial(
        _label_smoothing_kernel,
        confidence=float(confidence),
        smoothing=float(smoothing),
        num_classes=C,
    )

    per_row = pl.pallas_call(
        kernel,
        out_shape=jax.ShapeDtypeStruct((b_pad, 1), jnp.float32),
        grid=(num_tiles,),
        in_specs=[
            pl.BlockSpec((tile_b, C), lambda i: (i, 0)),   # logits tile (streamed)
            pl.BlockSpec((tile_b, 1), lambda i: (i, 0)),   # targets tile
        ],
        out_specs=pl.BlockSpec((tile_b, 1), lambda i: (i, 0)),  # per-row losses
        compiler_params=pltpu.CompilerParams(
            dimension_semantics=("parallel",),             # independent B tiles
            vmem_limit_bytes=vmem_limit_bytes,
        ),
    )(x, tgt2d)

    # Final reduction over the TRUE batch in the wrapper (padded rows sliced off).
    return jnp.sum(per_row[:B, 0]) * (1.0 / B)


def _ref_loss(x, target, smoothing):
    logprobs = jax.nn.log_softmax(x.astype(jnp.float32), axis=-1)
    nll = -jnp.take_along_axis(logprobs, target[:, None], axis=-1)[:, 0]
    smooth = -jnp.mean(logprobs, axis=-1)
    return jnp.mean((1.0 - smoothing) * nll + smoothing * smooth)


if __name__ == "__main__":
    key = jax.random.PRNGKey(0)
    kx, kt = jax.random.split(key)

    B, C = 8, 32
    smoothing = 0.1

    x = jax.random.normal(kx, (B, C), dtype=jnp.float32)
    target = jax.random.randint(kt, (B,), 0, C, dtype=jnp.int32)

    # f32 path
    loss = jax.block_until_ready(label_smoothing_loss(x, target, smoothing=smoothing))
    ref = _ref_loss(x, target, smoothing)
    assert jnp.allclose(loss, ref, atol=1e-5, rtol=1e-5), (loss, ref)

    # bf16-on-the-wire path (halves HBM bytes; kernel upcasts in-register)
    x_bf16 = x.astype(jnp.bfloat16)
    loss_bf16 = jax.block_until_ready(
        label_smoothing_loss(x_bf16, target, smoothing=smoothing))
    ref_bf16 = _ref_loss(x_bf16, target, smoothing)
    assert jnp.allclose(loss_bf16, ref_bf16, atol=1e-4, rtol=1e-4), (loss_bf16, ref_bf16)

    # Ragged batch (B not a multiple of the tile) exercises a multi-step
    # "parallel" grid with distinct per-tile output blocks.
    B2 = 13
    x2 = jax.random.normal(kx, (B2, C), dtype=jnp.float32)
    t2 = jax.random.randint(kt, (B2,), 0, C, dtype=jnp.int32)
    loss2 = jax.block_until_ready(
        label_smoothing_loss(x2, t2, smoothing=smoothing, tile_b=8))
    ref2 = _ref_loss(x2, t2, smoothing)
    assert jnp.allclose(loss2, ref2, atol=1e-5, rtol=1e-5), (loss2, ref2)

    print("KERNEL_OK")
</pallas_src>

<mosaic_0001>
module attributes {stable_mosaic.version = 11 : i64} {
  func.func @_label_smoothing_kernel(%arg0: i32, %arg1: memref<8x32xf32, #tpu.memory_space<vmem>>, %arg2: memref<8x1xi32, #tpu.memory_space<vmem>>, %arg3: memref<8x1xf32, #tpu.memory_space<vmem>>) attributes {dimension_semantics = [#tpu.dimension_semantics<parallel>], iteration_bounds = array<i64: 1>, scalar_prefetch = 0 : i64, scratch_operands = 0 : i64, tpu.core_type = #tpu.core_type<tc>, window_params = [{transform_indices = @transform_0, window_bounds = array<i64: 8, 32>}, {transform_indices = @transform_1, window_bounds = array<i64: 8, 1>}, {transform_indices = @transform_2, window_bounds = array<i64: 8, 1>}]} {
    %c0 = arith.constant 0 : index
    %c0_0 = arith.constant 0 : index
    %0 = vector.load %arg1[%c0, %c0_0] : memref<8x32xf32, #tpu.memory_space<vmem>>, vector<8x32xf32>
    %c0_1 = arith.constant 0 : index
    %c0_2 = arith.constant 0 : index
    %1 = vector.load %arg2[%c0_1, %c0_2] : memref<8x1xi32, #tpu.memory_space<vmem>>, vector<8x1xi32>
    %cst = arith.constant dense<0xFF800000> : vector<8xf32>
    %2 = vector.multi_reduction <maximumf>, %0, %cst [1] : vector<8x32xf32> to vector<8xf32>
    %3 = vector.shape_cast %2 : vector<8xf32> to vector<8x1xf32>
    %4 = vector.broadcast %3 : vector<8x1xf32> to vector<8x32xf32>
    %5 = arith.subf %0, %4 : vector<8x32xf32>
    %6 = math.exp %5 : vector<8x32xf32>
    %cst_3 = arith.constant dense<0.000000e+00> : vector<8xf32>
    %7 = vector.multi_reduction <add>, %6, %cst_3 [1] : vector<8x32xf32> to vector<8xf32>
    %8 = vector.shape_cast %7 : vector<8xf32> to vector<8x1xf32>
    %9 = math.log %8 : vector<8x1xf32>
    %10 = arith.addf %3, %9 : vector<8x1xf32>
    %11 = tpu.iota {dimensions = array<i32: 1>} : vector<1x32xi32>
    %12 = vector.broadcast %11 : vector<1x32xi32> to vector<8x32xi32>
    %13 = vector.broadcast %1 : vector<8x1xi32> to vector<8x32xi32>
    %14 = arith.cmpi eq, %12, %13 : vector<8x32xi32>
    %cst_4 = arith.constant 0.903124988 : f32
    %cst_5 = arith.constant 3.125000e-03 : f32
    %15 = vector.broadcast %cst_4 : f32 to vector<8x32xf32>
    %16 = vector.broadcast %cst_5 : f32 to vector<8x32xf32>
    %17 = arith.select %14, %15, %16 : vector<8x32xi1>, vector<8x32xf32>
    %18 = arith.mulf %17, %0 : vector<8x32xf32>
    %cst_6 = arith.constant dense<0.000000e+00> : vector<8xf32>
    %19 = vector.multi_reduction <add>, %18, %cst_6 [1] : vector<8x32xf32> to vector<8xf32>
    %20 = vector.shape_cast %19 : vector<8xf32> to vector<8x1xf32>
    %21 = arith.subf %10, %20 : vector<8x1xf32>
    %c0_7 = arith.constant 0 : index
    %c0_8 = arith.constant 0 : index
    %22 = vector.load %arg3[%c0_7, %c0_8] : memref<8x1xf32, #tpu.memory_space<vmem>>, vector<8x1xf32>
    tpu.vector_store %arg3[%c0_7, %c0_8], %21 {strides = array<i32>} : memref<8x1xf32, #tpu.memory_space<vmem>>, vector<8x1xf32>,
    return
  }
  func.func @transform_0(%arg0: i32) -> (i32, i32) {
    %c0_i32 = arith.constant 0 : i32
    %c0_i32_0 = arith.constant 0 : i32
    return %arg0, %c0_i32 : i32, i32
  }
  func.func @transform_1(%arg0: i32) -> (i32, i32) {
    %c0_i32 = arith.constant 0 : i32
    %c0_i32_0 = arith.constant 0 : i32
    return %arg0, %c0_i32 : i32, i32
  }
  func.func @transform_2(%arg0: i32) -> (i32, i32) {
    %c0_i32 = arith.constant 0 : i32
    %c0_i32_0 = arith.constant 0 : i32
    return %arg0, %c0_i32 : i32, i32
  }
}

</mosaic_0001>

<bundles_post_ra>
// kernel: tpu_custom_call.1
= control target key start
LH: loop header
LB: loop body
LE: loop exit
PB: predicated region body
PF: predicated region fallthrough
CT: control target
= control target key end

     0   :  { %vm13_vm0 = vcmask 261120   ;;  %v51_v1 = vmov 0   ;;  %v26_v9 = vlaneseq  ;;  %v52_v12 = vmov 0.003125   ;;  %s80_s0 = inlined_call_operand.vmem [shape: f32[8,32], index: 0, kind: input, shape index: {}]   ;;  %s81_s1 = inlined_call_operand.vmem [shape: s32[8,1], index: 1, kind: input, shape index: {}]   ;;  %s82_s2 = inlined_call_operand.vmem [shape: f32[8,1], index: 2, kind: output, shape index: {}]  }
   0x1   :  { %v11_v0 = vld [vmem:[%s80_s0] sm:$0xff]  ;;  %46 = vset.pattern.permute.xlu0 %v51_v1  ;;  %vm38_vm2 = vcmask 7168  }
   0x2   :  { %v14_v2 = vsel %vm13_vm0, %v11_v0, -inf  ;;  %v12_v3 = vld [vmem:[%s81_s1] sm:$0xff]  ;;  %v27_v10 = vand.u32 127, %v26_v9 }
   0x3   :  { %15 = vmax.xlane.f32.xlu0 %v14_v2 }
  0x17   :  { %29 = vperm.xlu0 %46, %v12_v3  }
  0x76   :  { %v16_v4 = vpop.xlane.xlu0 %15 }
  0x77   :  { %v17_v5 = vsub.f32 %v11_v0, %v16_v4 }
  0x79   :  { %v18_v6 = vmul.f32 1.442695, %v17_v5 }
  0x7b   :  { %47 = vpow2.f32 %v18_v6 }
  0x81   :  { %v48_v7 = vpop.eup %47 }
  0x82   :  { %v20_v8 = vsel %vm13_vm0, %v48_v7, 0.0 }
  0x83   :  { %21 = vadd.xlane.f32.xlu1 %v20_v8 }
  0x89   :  { %v30_v11 = vpop.permute.xlu0 %29 }
  0x8a   :  { %vm31_vm1 = vcmp.eq.s32.totalorder %v27_v10, %v30_v11 }
  0x8b   :  { %v32_v13 = vsel %vm31_vm1, 0.903125, %v52_v12 }
  0x8c   :  { %v33_v14 = vmul.f32 %v32_v13, %v11_v0 }
  0x8e   :  { %v34_v15 = vsel %vm13_vm0, %v33_v14, 0.0 }
  0x8f   :  { %35 = vadd.xlane.f32.xlu1 %v34_v15 }
  0xf6   :  { %v22_v16 = vpop.xlane.xlu1 %21 }
  0xf7   :  { %49 = vlog2.f32 %v22_v16 }
  0xfd   :  { %v50_v17 = vpop.eup %49 }
  0xfe   :  { %v24_v18 = vmul.f32 0.6931472, %v50_v17 }
 0x100   :  { %v25_v19 = vadd.f32 %v24_v18, %v16_v4 }
 0x102   :  { %v36_v20 = vpop.xlane.xlu1 %35 }
 0x103   :  { %v37_v21 = vsub.f32 %v25_v19, %v36_v20 }
 0x105   :  { %39 = vst.msk [vmem:[%s82_s2] sm:$0xff] %vm38_vm2, %v37_v21 }

</bundles_post_ra>
